<compile_context>
chip_gen: v5e
topology: v5e:2x2
jax: 0.10.0
libtpu: 0.0.40
codegen_flags: <defaults>
</compile_context>

<pallas_src>
import functools

import jax
import jax.numpy as jnp
import numpy as np
from jax.experimental import pallas as pl
from jax.experimental.pallas import tpu as pltpu


def _round_up(x, m):
    return (x + m - 1) // m * m


def prepare_weights(weights, out_channels, scale, dtype=jnp.bfloat16):
    """Reorder (OC*BS, C) weights (row k = weights_list[k], k = i*BS + j) into a
    j-grouped (BS, OC_pad, C) slab.  In a real module this runs once at init."""
    BS = scale ** 3
    OC = out_channels
    C = weights.shape[1]
    OCp = _round_up(OC, 8)                                    # sublane alignment
    w = jnp.transpose(weights.reshape(OC, BS, C), (1, 0, 2))  # (BS, OC, C)
    if OCp != OC:
        w = jnp.pad(w, ((0, 0), (0, OCp - OC), (0, 0)))
    return w.astype(dtype)


def _grouped_kernel(gid_ref, feat_ref, w_ref, out_ref):
    # gid_ref : (n_tiles,) int32 in SMEM (scalar prefetch; consumed by index_maps)
    # feat_ref: (C, TM)   compute dtype  -- gathered features for this row tile
    # w_ref   : (1, OCp, C) compute dtype -- weight slab of this tile's group j
    # out_ref : (OCp, TM) float32        -- lane-dense output tile
    del gid_ref
    out_ref[...] = jnp.dot(
        w_ref[0], feat_ref[...], preferred_element_type=jnp.float32
    ).astype(out_ref.dtype)


def voxel_unshuffle_inv_conv3d(features, weights, pair_fwd, num_out,
                               out_channels, scale,
                               compute_dtype=jnp.bfloat16,
                               tile_m=512,
                               vmem_limit_bytes=32 * 1024 * 1024):
    """
    features : (N, in_channels) float32   -- SparseConvTensor.features
    weights  : (out_channels*scale**3, in_channels) float32
               row k corresponds to weights_list[k], k = i*BS + j
    pair_fwd : (scale**3, N) int32        -- indice_dict[key].pair_fwd (-1 invalid)
    num_out  : static number of output active voxels (rows of out_features)
    Returns  : (num_out, out_channels) float32 out_features
    """
    N, C = features.shape
    BS = scale ** 3
    OC = out_channels
    OCp = _round_up(OC, 8)
    assert C % BS == 0, "in_channels should be divisible by scale^3"
    assert weights.shape == (OC * BS, C)
    assert pair_fwd.shape == (BS, N)

    if num_out == 0:
        return jnp.zeros((0, OC), jnp.float32)

    pair_fwd = pair_fwd.astype(jnp.int32)

    # ---- inverse "winner" map: last-write-wins in (l asc, then j asc) order ----
    order = (jnp.arange(N, dtype=jnp.int32)[None, :] * BS
             + jnp.arange(BS, dtype=jnp.int32)[:, None])              # (BS, N)
    valid = (pair_fwd >= 0) & (pair_fwd < num_out)   # drop OOB targets defensively
    tgt = jnp.where(valid, pair_fwd, 0)
    key = jnp.where(valid, order, -1)
    win = (jnp.full((num_out,), -1, dtype=jnp.int32)
           .at[tgt.reshape(-1)].max(key.reshape(-1)))                 # (num_out,)
    has_writer = win >= 0
    winc = jnp.maximum(win, 0)
    j_grp = jnp.where(has_writer, winc % BS, 0).astype(jnp.int32)     # group id
    l_map = jnp.where(has_writer, winc // BS, N).astype(jnp.int32)    # N -> zero row

    # ---- group output rows by kernel offset j, pad groups to tile multiples ----
    TM = min(tile_m, _round_up(num_out, 128))
    TM = _round_up(TM, 128)                                           # lane aligned
    counts = jnp.bincount(j_grp, length=BS).astype(jnp.int32)         # (BS,)
    padded = ((counts + TM - 1) // TM) * TM
    cum_end = jnp.cumsum(padded)
    grp_start = cum_end - padded
    unpadded_start = jnp.cumsum(counts) - counts

    M_buf = _round_up(num_out, TM) + BS * TM        # static bound on padded total
    n_tiles = M_buf // TM

    sort_idx = jnp.argsort(j_grp, stable=True)
    g_sorted = j_grp[sort_idx]
    rank = jnp.arange(num_out, dtype=jnp.int32) - unpadded_start[g_sorted]
    pos_sorted = (grp_start[g_sorted] + rank).astype(jnp.int32)

    # per-tile group id (scalar-prefetched into SMEM; drives the weight index_map)
    tile_start = jnp.arange(n_tiles, dtype=jnp.int32) * TM
    tile_gid = jnp.minimum(
        jnp.searchsorted(cum_end, tile_start, side='right'), BS - 1
    ).astype(jnp.int32)

    # ---- gathered, transposed (C, M_buf) feature slab (one fused XLA op) -------
    features_z = jnp.concatenate(
        [features, jnp.zeros((1, C), features.dtype)], axis=0)        # (N+1, C)
    l_buf = jnp.full((M_buf,), N, jnp.int32).at[pos_sorted].set(l_map[sort_idx])
    feat_buf_t = jnp.take(features_z, l_buf, axis=0).T.astype(compute_dtype)

    w3 = prepare_weights(weights, OC, scale, compute_dtype)           # (BS, OCp, C)

    out_t = pl.pallas_call(
        _grouped_kernel,
        out_shape=jax.ShapeDtypeStruct((OCp, M_buf), jnp.float32),
        grid_spec=pltpu.PrefetchScalarGridSpec(
            num_scalar_prefetch=1,
            grid=(n_tiles,),
            in_specs=[
                pl.BlockSpec((C, TM), lambda t, gid: (0, t)),          # features
                pl.BlockSpec((1, OCp, C), lambda t, gid: (gid[t], 0, 0)),  # w slab
            ],
            out_specs=pl.BlockSpec((OCp, TM), lambda t, gid: (0, t)),
        ),
        compiler_params=pltpu.CompilerParams(
            dimension_semantics=("parallel",),          # megacore sharding on v7x
            vmem_limit_bytes=vmem_limit_bytes),
    )(tile_gid, feat_buf_t, w3)                                       # (OCp, M_buf)

    # ---- read back in original output-row order --------------------------------
    pos = jnp.zeros((num_out,), jnp.int32).at[sort_idx].set(pos_sorted)
    return jnp.take(out_t.T, pos, axis=0)[:, :OC]


if __name__ == "__main__":
    key = jax.random.PRNGKey(0)
    in_channels, out_channels, scale = 16, 4, 2
    BS = scale ** 3                         # 8
    N = 16                                  # active input voxels (= pair_fwd cols)
    M = 32                                  # active output voxels

    k1, k2, k3 = jax.random.split(key, 3)
    features = jax.random.normal(k1, (N, in_channels), dtype=jnp.float32)
    weights = jax.random.normal(k2, (out_channels * BS, in_channels),
                                dtype=jnp.float32)
    pair_fwd = jax.random.randint(k3, (BS, N), -1, M, dtype=jnp.int32)
    # TODO(synk): spconv SparseConvTensor / indice_dict construction has no Pallas
    # equivalent; out_indices are carried along unchanged (not computed here).
    # TODO(synk): only the 'sequential' pairing style is implemented (shuffle +
    # per-line view(-1) is then the identity on feature rows).
    out_indices = jnp.zeros((M, 4), jnp.int32)

    fn = jax.jit(functools.partial(
        voxel_unshuffle_inv_conv3d,
        num_out=M, out_channels=out_channels, scale=scale))
    out = jax.block_until_ready(fn(features, weights, pair_fwd))

    # ---- pure-numpy reference of the PyTorch loop semantics --------------------
    # Inputs rounded to bf16 to match the kernel's bf16 operands (f32 accumulate).
    f_bf = np.asarray(features.astype(jnp.bfloat16).astype(jnp.float32))
    w_bf = np.asarray(weights.astype(jnp.bfloat16).astype(jnp.float32))
    pf = np.asarray(pair_fwd)
    ref = np.zeros((M, out_channels), np.float32)
    for l in range(N):   # VoxelShuffle(sequential) + view(-1) == original row l
        for i in range(out_channels):
            for j in range(BS):
                mv = pf[j, l]
                if mv != -1:
                    ref[mv, i] = np.dot(w_bf[i * BS + j], f_bf[l])

    np.testing.assert_allclose(np.asarray(out), ref, rtol=1e-3, atol=1e-3)
    print("KERNEL_OK")
</pallas_src>

<mosaic_0001>
module attributes {stable_mosaic.version = 11 : i64} {
  func.func @_grouped_kernel(%arg0: i32, %arg1: memref<9xi32, #tpu.memory_space<smem>>, %arg2: memref<16x128xbf16, #tpu.memory_space<vmem>>, %arg3: memref<1x8x16xbf16, #tpu.memory_space<vmem>>, %arg4: memref<8x128xf32, #tpu.memory_space<vmem>>) attributes {dimension_semantics = [#tpu.dimension_semantics<parallel>], iteration_bounds = array<i64: 9>, scalar_prefetch = 1 : i64, scratch_operands = 0 : i64, tpu.core_type = #tpu.core_type<tc>, window_params = [{transform_indices = @transform_0, window_bounds = array<i64: 16, 128>}, {transform_indices = @transform_1, window_bounds = array<i64: 1, 8, 16>}, {transform_indices = @transform_2, window_bounds = array<i64: 8, 128>}]} {
    %c0 = arith.constant 0 : index
    %c0_0 = arith.constant 0 : index
    %c0_1 = arith.constant 0 : index
    %0 = vector.load %arg3[%c0, %c0_0, %c0_1] : memref<1x8x16xbf16, #tpu.memory_space<vmem>>, vector<1x8x16xbf16>
    %1 = vector.shape_cast %0 : vector<1x8x16xbf16> to vector<8x16xbf16>
    %c0_2 = arith.constant 0 : index
    %c0_3 = arith.constant 0 : index
    %2 = vector.load %arg2[%c0_2, %c0_3] : memref<16x128xbf16, #tpu.memory_space<vmem>>, vector<16x128xbf16>
    %cst = arith.constant dense<0.000000e+00> : vector<8x128xf32>
    %3 = tpu.matmul %1, %2, %cst {dimension_numbers = #tpu.dot_dimension_numbers<[1], [0], [0], [1], [0, 0, 1, 1], [], []>} : vector<8x16xbf16>, vector<16x128xbf16>, vector<8x128xf32> -> vector<8x128xf32>
    %c0_4 = arith.constant 0 : index
    %c0_5 = arith.constant 0 : index
    %4 = vector.load %arg4[%c0_4, %c0_5] : memref<8x128xf32, #tpu.memory_space<vmem>>, vector<8x128xf32>
    tpu.vector_store %arg4[%c0_4, %c0_5], %3 {strides = array<i32>} : memref<8x128xf32, #tpu.memory_space<vmem>>, vector<8x128xf32>,
    return
  }
  func.func @transform_0(%arg0: i32, %arg1: memref<9xi32, #tpu.memory_space<smem>>) -> (i32, i32) {
    %c0_i32 = arith.constant 0 : i32
    %c0_i32_0 = arith.constant 0 : i32
    return %c0_i32, %arg0 : i32, i32
  }
  func.func @transform_1(%arg0: i32, %arg1: memref<9xi32, #tpu.memory_space<smem>>) -> (i32, i32, i32) {
    %0 = arith.index_cast %arg0 : i32 to index
    %1 = memref.load %arg1[%0] : memref<9xi32, #tpu.memory_space<smem>>
    %c0_i32 = arith.constant 0 : i32
    %c0_i32_0 = arith.constant 0 : i32
    %c0_i32_1 = arith.constant 0 : i32
    return %1, %c0_i32, %c0_i32_0 : i32, i32, i32
  }
  func.func @transform_2(%arg0: i32, %arg1: memref<9xi32, #tpu.memory_space<smem>>) -> (i32, i32) {
    %c0_i32 = arith.constant 0 : i32
    %c0_i32_0 = arith.constant 0 : i32
    return %c0_i32, %arg0 : i32, i32
  }
}

</mosaic_0001>

<bundles_post_ra>
// kernel: custom-call
= control target key start
LH: loop header
LB: loop body
LE: loop exit
PB: predicated region body
PF: predicated region fallthrough
CT: control target
= control target key end

     0   :  { %s6_s0 = inlined_call_operand.vmem [shape: u32[9], index: 0, kind: output, shape index: {}]  }

// kernel: voxel_unshuffle_inv_conv3d.1
= control target key start
LH: loop header
LB: loop body
LE: loop exit
PB: predicated region body
PF: predicated region fallthrough
CT: control target
= control target key end

     0   :  { %s402_s15 = smov [#allocation3]   ;;  %s474_s0 = inlined_call_operand.vmem [shape: s32[9], index: 0, kind: input, shape index: {}]   ;;  %s475_s1 = inlined_call_operand.vmem [shape: bf16[16,1152], index: 1, kind: input, shape index: {}]   ;;  %s476_s2 = inlined_call_operand.vmem [shape: bf16[8,8,16], index: 2, kind: input, shape index: {}]   ;;  %s477_s3 = inlined_call_operand.vmem [shape: f32[8,1152], index: 3, kind: output, shape index: {}]  }
   0x1   :  { %s9_s14 = sshll.u32 %s474_s0, 4  ;;  %s10_s14 = int_to_ptr.vmem [resolvable:$true] %s9_s14 }
   0x2   :  { %12 = dma.vmem_to_smem %s10_s14, 16, %s402_s15, [#allocation2] }
   0x3   :  { %388 = dma.done.wait [#allocation2], 16 }
   0x4   :  { %389 = vsyncadd [#allocation2], 4294967280 }
   0x5   :  { %15 = sfence }
   0x6   :  { %s426_s16 = smov 0   ;;  %s428_s17 = smov 0  }
   0x7   :  { %s430_s18 = smov 0  }
   0x8 LB: > { %s439_s0 = sadd.s32 4294967295, %s400_s18   ;;  %s441_s19 = sadd.s32 1, %s400_s18   ;;  %s400_s18 = sphi %s430_s18, %s480_s18   ;;  %s396_s17 = sphi %s428_s17, %s479_s17   ;;  %s392_s16 = sphi %s426_s16, %s478_s16  }
   0x9   : > { %s25_s20 = ssub.s32 %s400_s18, %s441_s19  ;;  %s28_s21 = sadd.s32 1, %s396_s17 }
   0xa   : > { %p26_p0 = scmp.eq.s32.totalorder %s25_s20, 0  ;;  %p35_p1 = scmp.ne.s32.totalorder %s396_s17, %s392_s16 }
   0xb   : > { %p36_p2 = scmp.eq.s32.totalorder %s400_s18, 0  ;;  %p324_p4 = scmp.ge.s32.totalorder %s400_s18, 9 }
   0xc   : > { %s448_s22 = scalar_select %p26_p0, %s396_s17, %s28_s21  }
   0xd   : > { %p37_p3 = por %p36_p2, %p35_p1  ;;  %115 = sbr.rel (%p324_p4) target bundleno = 24 (0x18), region = 16 }
  0x12   : > { %118 = sbr.rel (!%p37_p3) target bundleno = 24 (0x18), region = 20  ;;  %s120_s23 = sand.u32 (%p37_p3), 1, %s396_s17  }
  0x13   : > { %s326_s24 = sshll.u32 (%p37_p3), %s400_s18, 2  ;;  %s325_s25 = sshll.u32 (%p37_p3), %s120_s23, 3 }
  0x14   : > { %s124_s28 = scalar_lea.vmem (%p37_p3), %s475_s1, %s326_s24  ;;  %s122_s29 = scalar_lea.vmem (%p37_p3), [#allocation4], %s325_s25 }
  0x15   : > { %v141_v0 = vld [vmem:[%s124_s28] sm:$0xf] (%p37_p3)  ;;  %v143_v1 = vld [vmem:[%s124_s28 + $0x24] sm:$0xf] (%p37_p3) }
  0x16   : > { %142 = vst [vmem:[%s122_s29] sm:$0xf] (%p37_p3), %v141_v0 }
  0x17   : > { %144 = vst [vmem:[%s122_s29 + $0x4] sm:$0xf] %v143_v1 }
  0x18 PF: > { %p327_p5 = scmp.ge.s32.totalorder %s400_s18, 1  ;;  %p180_p6 = scmp.lt.s32.totalorder %s400_s18, 10 }
  0x1a   : > { %p181_p7 = pnand %p327_p5, %p180_p6 }
  0x1b   : > { %s187_s30 = sand.u32 (!%p181_p7), 1, %s392_s16   ;;  %s212_s4 = sld [smem:[#allocation3 + %s439_s0]] (!%p181_p7) }
  0x1c   : > { %184 = sbr.rel (%p181_p7) target bundleno = 173 (0xad), region = 65  ;;  %s328_s5 = sshll.u32 (!%p181_p7), %s187_s30, 3 }
  0x1d   : > { %s189_s6 = scalar_lea.vmem (!%p181_p7), [#allocation4], %s328_s5  ;;  %p218_p9 = scmp.lt.s32.totalorder (!%p181_p7), %s439_s0, 8 }
  0x21   : > { %v338_v2 = vld [vmem:[%s189_s6] sm:$0xff]  ;;  %p213_p8 = scmp.lt.s32.totalorder %s212_s4, 7  ;;  %vm232_vm0 = vcmask 130048   ;;  %s484_s0 = smov (!%p218_p9, %s439_s0), 8 }
  0x22   : > { %243 = vmatpush.bf16.msra.mxu0 %v338_v2  ;;  %s330_s11 = sshll.u32 %s484_s0, 3 }
  0x23   : > { %s482_s4 = smov (!%p213_p8, %s212_s4), 7  ;;  %s221_s14 = scalar_lea.vmem %s477_s3, %s330_s11 }
  0x24   : > { %s329_s7 = sshll.u32 %s482_s4, 2 }
  0x25   : > { %s216_s10 = scalar_lea.vmem %s476_s2, %s329_s7 }
  0x26   : > { %v223_v3 = vld [vmem:[%s216_s10] sm:$0xf] }
  0x27   : > { %335 = vmatmul.msk.bf16.vlgmr.msra.gmra.mxu0 %vm232_vm0, %v223_v3 }
  0xa4   : > { %v245_v4 = vpop.f32.mrf.mxu0 }
  0xa5   : > { %249 = vst [vmem:[%s221_s14] sm:$0xff] %v245_v4 }
  0xac   : > { %v247_v5 = vpop.f32.mrf.mxu0 }
  0xad PF: > { %p18_p10 = scmp.ge.s32.totalorder %s441_s19, 11   ;;  %s478_s16 = smov %s396_s17 }
  0xae   : > { %s479_s17 = smov %s448_s22  ;;  %s480_s18 = smov %s441_s19 }
  0xaf   :  { %20 = sbr.rel (!%p18_p10) target bundleno = 8 (0x8), region = 107 }

</bundles_post_ra>
